<compile_context>
chip_gen: v7x
topology: tpu7x:2x2x1
jax: 0.10.0
libtpu: 0.0.40
codegen_flags: <defaults>
</compile_context>

<pallas_src>
import numpy as np
import jax
import jax.numpy as jnp
from jax.experimental import pallas as pl
from jax.experimental.pallas import tpu as pltpu


# ----------------------------------------------------------------------------
# Pallas kernel: band-limited ASM propagation + intensity + normalisation
# ----------------------------------------------------------------------------
def asm_kernel(amp_ref, phi_ref, frfi_ref, fbs_ref, hri_ref, i_ref):
    N = amp_ref.shape[0]
    two_pi = jnp.float32(2.0 * np.pi)

    # u = amp * exp(i * 2*pi*phi)
    ph = phi_ref[...] * two_pi
    amp = amp_ref[...]
    ur = amp * jnp.cos(ph)
    ui = amp * jnp.sin(ph)

    FrFi = frfi_ref[...]   # (N, 2N)   = [Fr | Fi]
    FB_f = fbs_ref[0]      # (2N, 2N)  = [[Fr,  Fi], [-Fi, Fr]]   (forward, right side)
    FB_i = fbs_ref[1]      # (2N, 2N)  = [[Fr, -Fi], [ Fi, Fr]]   (conj,    right side)
    Hr = hri_ref[0]        # (N, N)
    Hi = hri_ref[1]        # (N, N)

    # ---- forward 2D DFT:  U = F @ u @ F  (F symmetric) ----------------------
    # left transform as ONE matmul: [Fr|Fi] @ [[ur|ui];[-ui|ur]] = [Tr|Ti]
    u_stack = jnp.concatenate(
        [jnp.concatenate([ur, ui], axis=1),
         jnp.concatenate([-ui, ur], axis=1)], axis=0)                 # (2N, 2N)
    tw = jnp.dot(FrFi, u_stack, preferred_element_type=jnp.float32)   # (N, 2N)
    # right transform: [Tr|Ti] @ [[Fr,Fi],[-Fi,Fr]] = [Ur|Ui]
    uw = jnp.dot(tw, FB_f, preferred_element_type=jnp.float32)        # (N, 2N)

    # ---- elementwise multiply by band-limited transfer function H -----------
    Ur = uw[:, :N]
    Ui = uw[:, N:]
    Vr = Ur * Hr - Ui * Hi
    Vi = Ur * Hi + Ui * Hr

    # ---- (unnormalised) inverse 2D DFT:  E  ∝  conj(F) @ V @ conj(F) --------
    # left transform: [Fr|Fi] @ [[Vr|Vi];[Vi|-Vr]] = [Sr|Si]
    v_stack = jnp.concatenate(
        [jnp.concatenate([Vr, Vi], axis=1),
         jnp.concatenate([Vi, -Vr], axis=1)], axis=0)                 # (2N, 2N)
    sw = jnp.dot(FrFi, v_stack, preferred_element_type=jnp.float32)   # (N, 2N)
    # right transform: [Sr|Si] @ [[Fr,-Fi],[Fi,Fr]] = [Er|Ei]
    ew = jnp.dot(sw, FB_i, preferred_element_type=jnp.float32)        # (N, 2N)

    # ---- I = |E|^2 normalised by its max (constant scale on E cancels) ------
    Er = ew[:, :N]
    Ei = ew[:, N:]
    I = Er * Er + Ei * Ei
    m = jnp.max(I)
    inv = 1.0 / jnp.maximum(m, jnp.float32(1e-30))  # 1 scalar divide, N^2 muls
    i_ref[...] = I * inv


# ----------------------------------------------------------------------------
# Host-side precompute: DFT matrix, block constants, band-limited transfer fn
# ----------------------------------------------------------------------------
def make_dft_matrix(N):
    n = np.arange(N)
    F = np.exp(-2j * np.pi * np.outer(n, n) / N)   # forward DFT matrix (symmetric)
    return F.real.astype(np.float32), F.imag.astype(np.float32)


def make_band_limited_transfer(N, propZ, mesh, lambda0):
    # mesh = pixel pitch dx; standard band-limited ASM (Matsushima & Shimobaba)
    fx = np.fft.fftfreq(N, d=mesh)
    FX, FY = np.meshgrid(fx, fx, indexing="ij")
    arg = 1.0 - (lambda0 * FX) ** 2 - (lambda0 * FY) ** 2
    kz = (2.0 * np.pi / lambda0) * np.sqrt(np.maximum(arg, 0.0))
    H = np.where(arg >= 0.0, np.exp(1j * kz * propZ), 0.0 + 0.0j)
    # band limit
    df = 1.0 / (N * mesh)
    f_limit = 1.0 / (lambda0 * np.sqrt((2.0 * df * propZ) ** 2 + 1.0))
    bl_mask = (np.abs(FX) <= f_limit) & (np.abs(FY) <= f_limit)
    H = H * bl_mask
    return H.real.astype(np.float32), H.imag.astype(np.float32)


# ----------------------------------------------------------------------------
# Model wrapper (equivalent of Model.forward)
# ----------------------------------------------------------------------------
class PallasASMModel:
    def __init__(self, input_dim, propZ, mesh, lambda0):
        N = int(input_dim)
        self.N = N
        # nn.Parameter(torch.ones((N, N)))   (phi0 is unused in forward)
        self.phi = jnp.ones((N, N), jnp.float32)

        Fr, Fi = make_dft_matrix(N)
        Hr, Hi = make_band_limited_transfer(N, propZ, mesh, lambda0)
        self.Hr, self.Hi = jnp.asarray(Hr), jnp.asarray(Hi)

        # Packed kernel constants (built once on host):
        #   frfi : [Fr | Fi]                              (N, 2N)
        #   fbs  : [[Fr, Fi],[-Fi, Fr]] , [[Fr,-Fi],[Fi,Fr]]   (2, 2N, 2N)
        #   hri  : [Hr, Hi]                               (2, N, N)
        self.frfi = jnp.asarray(np.concatenate([Fr, Fi], axis=1))
        fb_fwd = np.block([[Fr, Fi], [-Fi, Fr]]).astype(np.float32)
        fb_inv = np.block([[Fr, -Fi], [Fi, Fr]]).astype(np.float32)
        self.fbs = jnp.asarray(np.stack([fb_fwd, fb_inv], axis=0))
        self.hri = jnp.asarray(np.stack([Hr, Hi], axis=0))

        vmem_spec = pl.BlockSpec(memory_space=pltpu.MemorySpace.VMEM)
        # No grid: single invocation, whole planes resident in VMEM and
        # single-buffered (no double-buffering of constants).  32 MiB scoped
        # VMEM is valid on v5e/v6e/v7x and leaves ample headroom.
        self._call = jax.jit(pl.pallas_call(
            asm_kernel,
            out_shape=jax.ShapeDtypeStruct((N, N), jnp.float32),
            in_specs=[vmem_spec] * 5,
            out_specs=vmem_spec,
            compiler_params=pltpu.CompilerParams(vmem_limit_bytes=32 << 20),
        ))

    def __call__(self, amp):
        return self._call(amp.astype(jnp.float32), self.phi,
                          self.frfi, self.fbs, self.hri)


if __name__ == "__main__":
    # small, deterministic setup
    input_dim = 32
    propZ = 5e-3          # propagation distance [m]
    mesh = 8e-6           # pixel pitch [m]
    lambda0 = 632.8e-9    # wavelength [m]

    key = jax.random.PRNGKey(0)
    amp = jax.random.uniform(key, (input_dim, input_dim), dtype=jnp.float32)

    model = PallasASMModel(input_dim, propZ, mesh, lambda0)
    I_image = jax.block_until_ready(model(amp))

    assert I_image.shape == (input_dim, input_dim)
    I_np = np.asarray(I_image)
    assert np.isfinite(I_np).all()
    assert abs(float(I_np.max()) - 1.0) < 1e-4

    # Cross-check the fused DFT/H/IDFT chain against jnp.fft (same H, same phi).
    u = amp.astype(jnp.complex64) * jnp.exp(
        1j * (model.phi * jnp.float32(2.0 * np.pi)).astype(jnp.complex64))
    H = model.Hr.astype(jnp.complex64) + 1j * model.Hi.astype(jnp.complex64)
    E_ref = jnp.fft.ifft2(jnp.fft.fft2(u) * H)
    I_ref = jnp.abs(E_ref) ** 2
    I_ref = I_ref / jnp.max(I_ref)
    np.testing.assert_allclose(I_np, np.asarray(I_ref), atol=5e-3)

    print("KERNEL_OK")
</pallas_src>

<mosaic_0001>
module attributes {stable_mosaic.version = 11 : i64} {
  func.func @asm_kernel(%arg0: memref<32x32xf32, #tpu.memory_space<vmem>>, %arg1: memref<32x32xf32, #tpu.memory_space<vmem>>, %arg2: memref<32x64xf32, #tpu.memory_space<vmem>>, %arg3: memref<2x64x64xf32, #tpu.memory_space<vmem>>, %arg4: memref<2x32x32xf32, #tpu.memory_space<vmem>>, %arg5: memref<32x32xf32, #tpu.memory_space<vmem>>) attributes {dimension_semantics = [], scalar_prefetch = 0 : i64, scratch_operands = 0 : i64, tpu.core_type = #tpu.core_type<tc>} {
    %c0 = arith.constant 0 : index
    %c0_0 = arith.constant 0 : index
    %0 = vector.load %arg1[%c0, %c0_0] : memref<32x32xf32, #tpu.memory_space<vmem>>, vector<32x32xf32>
    %cst = arith.constant 6.28318548 : f32
    %1 = vector.broadcast %cst : f32 to vector<32x32xf32>
    %2 = arith.mulf %0, %1 : vector<32x32xf32>
    %c0_1 = arith.constant 0 : index
    %c0_2 = arith.constant 0 : index
    %3 = vector.load %arg0[%c0_1, %c0_2] : memref<32x32xf32, #tpu.memory_space<vmem>>, vector<32x32xf32>
    %4 = math.cos %2 : vector<32x32xf32>
    %5 = arith.mulf %3, %4 : vector<32x32xf32>
    %6 = math.sin %2 : vector<32x32xf32>
    %7 = arith.mulf %3, %6 : vector<32x32xf32>
    %c0_3 = arith.constant 0 : index
    %c0_4 = arith.constant 0 : index
    %8 = vector.load %arg2[%c0_3, %c0_4] : memref<32x64xf32, #tpu.memory_space<vmem>>, vector<32x64xf32>
    %c0_5 = arith.constant 0 : index
    %c0_6 = arith.constant 0 : index
    %c0_7 = arith.constant 0 : index
    %9 = vector.load %arg3[%c0_5, %c0_6, %c0_7] : memref<2x64x64xf32, #tpu.memory_space<vmem>>, vector<1x64x64xf32>
    %10 = vector.shape_cast %9 : vector<1x64x64xf32> to vector<64x64xf32>
    %c1 = arith.constant 1 : index
    %c0_8 = arith.constant 0 : index
    %c0_9 = arith.constant 0 : index
    %11 = vector.load %arg3[%c1, %c0_8, %c0_9] : memref<2x64x64xf32, #tpu.memory_space<vmem>>, vector<1x64x64xf32>
    %12 = vector.shape_cast %11 : vector<1x64x64xf32> to vector<64x64xf32>
    %c0_10 = arith.constant 0 : index
    %c0_11 = arith.constant 0 : index
    %c0_12 = arith.constant 0 : index
    %13 = vector.load %arg4[%c0_10, %c0_11, %c0_12] : memref<2x32x32xf32, #tpu.memory_space<vmem>>, vector<1x32x32xf32>
    %14 = vector.shape_cast %13 : vector<1x32x32xf32> to vector<32x32xf32>
    %c1_13 = arith.constant 1 : index
    %c0_14 = arith.constant 0 : index
    %c0_15 = arith.constant 0 : index
    %15 = vector.load %arg4[%c1_13, %c0_14, %c0_15] : memref<2x32x32xf32, #tpu.memory_space<vmem>>, vector<1x32x32xf32>
    %16 = vector.shape_cast %15 : vector<1x32x32xf32> to vector<32x32xf32>
    %17 = tpu.concatenate %5, %7 in 1 : vector<32x32xf32>, vector<32x32xf32> -> vector<32x64xf32>
    %cst_16 = arith.constant 0.000000e+00 : f32
    %18 = vector.broadcast %cst_16 : f32 to vector<32x32xf32>
    %19 = arith.subf %18, %7 : vector<32x32xf32>
    %20 = tpu.concatenate %19, %5 in 1 : vector<32x32xf32>, vector<32x32xf32> -> vector<32x64xf32>
    %21 = tpu.concatenate %17, %20 in 0 : vector<32x64xf32>, vector<32x64xf32> -> vector<64x64xf32>
    %cst_17 = arith.constant dense<0.000000e+00> : vector<32x64xf32>
    %22 = tpu.matmul %8, %21, %cst_17 {dimension_numbers = #tpu.dot_dimension_numbers<[1], [0], [0], [1], [0, 0, 1, 1], [], []>} : vector<32x64xf32>, vector<64x64xf32>, vector<32x64xf32> -> vector<32x64xf32>
    %cst_18 = arith.constant dense<0.000000e+00> : vector<32x64xf32>
    %23 = tpu.matmul %22, %10, %cst_18 {dimension_numbers = #tpu.dot_dimension_numbers<[1], [0], [0], [1], [0, 0, 1, 1], [], []>} : vector<32x64xf32>, vector<64x64xf32>, vector<32x64xf32> -> vector<32x64xf32>
    %24 = vector.extract_strided_slice %23 {offsets = [0, 0], sizes = [32, 32], strides = [1, 1]} : vector<32x64xf32> to vector<32x32xf32>
    %25 = vector.extract_strided_slice %23 {offsets = [0, 32], sizes = [32, 32], strides = [1, 1]} : vector<32x64xf32> to vector<32x32xf32>
    %26 = arith.mulf %24, %14 : vector<32x32xf32>
    %27 = arith.mulf %25, %16 : vector<32x32xf32>
    %28 = arith.subf %26, %27 : vector<32x32xf32>
    %29 = arith.mulf %24, %16 : vector<32x32xf32>
    %30 = arith.mulf %25, %14 : vector<32x32xf32>
    %31 = arith.addf %29, %30 : vector<32x32xf32>
    %32 = tpu.concatenate %28, %31 in 1 : vector<32x32xf32>, vector<32x32xf32> -> vector<32x64xf32>
    %cst_19 = arith.constant 0.000000e+00 : f32
    %33 = vector.broadcast %cst_19 : f32 to vector<32x32xf32>
    %34 = arith.subf %33, %28 : vector<32x32xf32>
    %35 = tpu.concatenate %31, %34 in 1 : vector<32x32xf32>, vector<32x32xf32> -> vector<32x64xf32>
    %36 = tpu.concatenate %32, %35 in 0 : vector<32x64xf32>, vector<32x64xf32> -> vector<64x64xf32>
    %cst_20 = arith.constant dense<0.000000e+00> : vector<32x64xf32>
    %37 = tpu.matmul %8, %36, %cst_20 {dimension_numbers = #tpu.dot_dimension_numbers<[1], [0], [0], [1], [0, 0, 1, 1], [], []>} : vector<32x64xf32>, vector<64x64xf32>, vector<32x64xf32> -> vector<32x64xf32>
    %cst_21 = arith.constant dense<0.000000e+00> : vector<32x64xf32>
    %38 = tpu.matmul %37, %12, %cst_21 {dimension_numbers = #tpu.dot_dimension_numbers<[1], [0], [0], [1], [0, 0, 1, 1], [], []>} : vector<32x64xf32>, vector<64x64xf32>, vector<32x64xf32> -> vector<32x64xf32>
    %39 = vector.extract_strided_slice %38 {offsets = [0, 0], sizes = [32, 32], strides = [1, 1]} : vector<32x64xf32> to vector<32x32xf32>
    %40 = vector.extract_strided_slice %38 {offsets = [0, 32], sizes = [32, 32], strides = [1, 1]} : vector<32x64xf32> to vector<32x32xf32>
    %41 = arith.mulf %39, %39 : vector<32x32xf32>
    %42 = arith.mulf %40, %40 : vector<32x32xf32>
    %43 = arith.addf %41, %42 : vector<32x32xf32>
    %44 = vector.shape_cast %43 : vector<32x32xf32> to vector<1x32x32xf32>
    %cst_22 = arith.constant dense<0xFF800000> : vector<1xf32>
    %45 = vector.multi_reduction <maximumf>, %44, %cst_22 [1, 2] : vector<1x32x32xf32> to vector<1xf32>
    %46 = vector.shape_cast %45 : vector<1xf32> to vector<1x1x1xf32>
    %47 = vector.extract %46[0, 0, 0] : f32 from vector<1x1x1xf32>
    %cst_23 = arith.constant 1.000000e-30 : f32
    %48 = arith.maximumf %47, %cst_23 : f32
    %cst_24 = arith.constant 1.000000e+00 : f32
    %49 = arith.divf %cst_24, %48 : f32
    %50 = vector.broadcast %49 : f32 to vector<32x32xf32>
    %51 = arith.mulf %43, %50 : vector<32x32xf32>
    %c0_25 = arith.constant 0 : index
    %c0_26 = arith.constant 0 : index
    %52 = vector.load %arg5[%c0_25, %c0_26] : memref<32x32xf32, #tpu.memory_space<vmem>>, vector<32x32xf32>
    tpu.vector_store %arg5[%c0_25, %c0_26], %51 {strides = array<i32>} : memref<32x32xf32, #tpu.memory_space<vmem>>, vector<32x32xf32>,
    return
  }
}

</mosaic_0001>

<bundles_post_ra>
// kernel: tpu_custom_call.1
= control target key start
LH: loop header
LB: loop body
LE: loop exit
PB: predicated region body
PF: predicated region fallthrough
CT: control target
= control target key end

     0   :  { %10 = vsyncpa [#allocation3], 0  ;;  %s2687_s0 = inlined_call_operand.hbm [shape: f32[32,32], index: 0, kind: input, shape index: {}]   ;;  %s2688_s1 = inlined_call_operand.hbm [shape: f32[32,32], index: 1, kind: input, shape index: {}]   ;;  %s2689_s2 = inlined_call_operand.hbm [shape: f32[32,64], index: 2, kind: input, shape index: {}]   ;;  %s2690_s3 = inlined_call_operand.hbm [shape: f32[2,64,64], index: 3, kind: input, shape index: {}]   ;;  %s2691_s4 = inlined_call_operand.hbm [shape: f32[2,32,32], index: 4, kind: input, shape index: {}]   ;;  %s2692_s5 = inlined_call_operand.hbm [shape: f32[32,32], index: 5, kind: output, shape index: {}]  }
   0x1   :  { %11 = vsyncpa [#allocation6], 0 }
   0x2   :  { %12 = vsyncpa [#allocation9], 0 }
   0x3   :  { %13 = vsyncpa [#allocation4], 0  ;;  %s2076_s18 = smov [#allocation5]   ;;  %s2077_s20 = smov [#allocation8]  }
   0x4   :  { %s31_s19 = sshll.u32 %s2076_s18, 4  ;;  %s55_s21 = sshll.u32 %s2077_s20, 4  ;;  %s32_s19 = int_to_ptr.vmem [resolvable:$true] %s31_s19  ;;  %s2123_s21 = int_to_ptr.vmem [resolvable:$true] %s55_s21 }
   0x5   :  { %s1936_s24 = scalar_lea.hbm %s2688_s1, 512 }
   0x6   :  { %p1937_p0 = scmp.ne.s32.totalorder %s2688_s1, %s1936_s24  ;;  %p1940_p1 = scmp.lt.u32.totalorder %s1936_s24, %s2688_s1 }
   0x8   :  { %p1942_p2 = pnand %p1940_p1, %p1937_p0 }
   0xa   :  { %1945 = shalt.err (!%p1942_p2)
}
   0xb   :  { %s1946_s29 = scalar_lea.vmem %s32_s19, 512  ;;  %p1951_p4 = scmp.lt.s32.totalorder %s32_s19, %s32_s19 }
   0xc   :  { %p1947_p3 = scmp.ne.s32.totalorder %s32_s19, %s1946_s29  ;;  %p1952_p5 = scmp.lt.s32.totalorder %s1946_s29, %s1946_s29 }
   0xe   :  { %p1953_p6 = por %p1952_p5, %p1951_p4 }
  0x10   :  { %p1954_p7 = pnand %p1953_p6, %p1947_p3 }
  0x12   :  { %1957 = shalt.err (!%p1954_p7)
}
  0x13   :  { %s2078_s30 = smov 128   ;;  %s2079_s6 = smov 8  }
  0x14   :  { %37 = dma.hbm_to_vmem [thread:$0]  %s2688_s1, 512, %s32_s19, [#allocation6], %s2078_s30, %s2078_s30, %s2079_s6  }
  0x15   :  { %s1958_s11 = scalar_lea.hbm %s2690_s3, 2048 }
  0x16   :  { %p1959_p8 = scmp.ne.s32.totalorder %s2690_s3, %s1958_s11  ;;  %p1962_p9 = scmp.lt.u32.totalorder %s1958_s11, %s2690_s3 }
  0x18   :  { %p1964_p10 = pnand %p1962_p9, %p1959_p8 }
  0x1a   :  { %1967 = shalt.err (!%p1964_p10)
}
  0x1b   :  { %s1968_s16 = scalar_lea.vmem %s2123_s21, 2048  ;;  %p1973_p12 = scmp.lt.s32.totalorder %s2123_s21, %s2123_s21 }
  0x1c   :  { %p1969_p11 = scmp.ne.s32.totalorder %s2123_s21, %s1968_s16  ;;  %p1974_p13 = scmp.lt.s32.totalorder %s1968_s16, %s1968_s16 }
  0x1e   :  { %p1975_p0 = por %p1974_p13, %p1973_p12 }
  0x20   :  { %p1976_p1 = pnand %p1975_p0, %p1969_p11 }
  0x22   :  { %1979 = shalt.err (!%p1976_p1)
}
  0x23   :  { %61 = dma.hbm_to_vmem [thread:$0]  %s2690_s3, 2048, %s2123_s21, [#allocation9], %s2078_s30, %s2078_s30, %s2079_s6  }
  0x24   :  { %s2080_s18 = smov [#allocation2]   ;;  %s2081_s20 = smov [#allocation7]  }
  0x25   :  { %s19_s19 = sshll.u32 %s2080_s18, 4  ;;  %s43_s22 = sshll.u32 %s2081_s20, 4  ;;  %s20_s19 = int_to_ptr.vmem [resolvable:$true] %s19_s19  ;;  %s2160_s22 = int_to_ptr.vmem [resolvable:$true] %s43_s22 }
  0x26   :  { %s1980_s25 = scalar_lea.hbm %s2687_s0, 512 }
  0x27   :  { %p1981_p2 = scmp.ne.s32.totalorder %s2687_s0, %s1980_s25  ;;  %p1984_p3 = scmp.lt.u32.totalorder %s1980_s25, %s2687_s0 }
  0x29   :  { %p1986_p4 = pnand %p1984_p3, %p1981_p2 }
  0x2b   :  { %1989 = shalt.err (!%p1986_p4)
}
  0x2c   :  { %s1990_s3 = scalar_lea.vmem %s20_s19, 512  ;;  %p1995_p6 = scmp.lt.s32.totalorder %s20_s19, %s20_s19 }
  0x2d   :  { %p1991_p5 = scmp.ne.s32.totalorder %s20_s19, %s1990_s3  ;;  %p1996_p7 = scmp.lt.s32.totalorder %s1990_s3, %s1990_s3 }
  0x2f   :  { %p1997_p8 = por %p1996_p7, %p1995_p6 }
  0x31   :  { %p1998_p9 = pnand %p1997_p8, %p1991_p5 }
  0x33   :  { %2001 = shalt.err (!%p1998_p9)
}
  0x34   :  { %25 = dma.hbm_to_vmem [thread:$0]  %s2687_s0, 512, %s20_s19, [#allocation3], %s2078_s30, %s2078_s30, %s2079_s6  }
  0x35   :  { %s2002_s10 = scalar_lea.hbm %s2689_s2, 512 }
  0x36   :  { %p2003_p10 = scmp.ne.s32.totalorder %s2689_s2, %s2002_s10  ;;  %p2006_p11 = scmp.lt.u32.totalorder %s2002_s10, %s2689_s2 }
  0x38   :  { %p2008_p12 = pnand %p2006_p11, %p2003_p10 }
  0x3a   :  { %2011 = shalt.err (!%p2008_p12)
}
  0x3b   :  { %s2012_s15 = scalar_lea.vmem %s2160_s22, 512  ;;  %p2017_p0 = scmp.lt.s32.totalorder %s2160_s22, %s2160_s22 }
  0x3c   :  { %p2013_p13 = scmp.ne.s32.totalorder %s2160_s22, %s2012_s15  ;;  %p2018_p1 = scmp.lt.s32.totalorder %s2012_s15, %s2012_s15 }
  0x3e   :  { %p2019_p2 = por %p2018_p1, %p2017_p0 }
  0x40   :  { %p2020_p3 = pnand %p2019_p2, %p2013_p13 }
  0x42   :  { %2023 = shalt.err (!%p2020_p3)
}
  0x43   :  { %49 = dma.hbm_to_vmem [thread:$0]  %s2689_s2, 512, %s2160_s22, [#allocation6], %s2078_s30, %s2078_s30, %s2079_s6  }
  0x44   :  { %s2082_s1 = smov [#allocation10]   ;;  %s2024_s20 = scalar_lea.hbm %s2691_s4, 1024 }
  0x45   :  { %s67_s17 = sshll.u32 %s2082_s1, 4  ;;  %p2025_p4 = scmp.ne.s32.totalorder %s2691_s4, %s2024_s20  ;;  %s68_s17 = int_to_ptr.vmem [resolvable:$true] %s67_s17 }
  0x46   :  { %p2028_p5 = scmp.lt.u32.totalorder %s2024_s20, %s2691_s4 }
  0x48   :  { %p2030_p6 = pnand %p2028_p5, %p2025_p4 }
  0x4a   :  { %2033 = shalt.err (!%p2030_p6)
}
  0x4b   :  { %s2034_s27 = scalar_lea.vmem %s68_s17, 1024  ;;  %p2039_p8 = scmp.lt.s32.totalorder %s68_s17, %s68_s17 }
  0x4c   :  { %p2035_p7 = scmp.ne.s32.totalorder %s68_s17, %s2034_s27  ;;  %p2040_p9 = scmp.lt.s32.totalorder %s2034_s27, %s2034_s27 }
  0x4e   :  { %p2041_p10 = por %p2040_p9, %p2039_p8 }
  0x50   :  { %p2042_p11 = pnand %p2041_p10, %p2035_p7 }
  0x52   :  { %2045 = shalt.err (!%p2042_p11)
}
  0x53   :  { %73 = dma.hbm_to_vmem [thread:$0]  %s2691_s4, 1024, %s68_s17, [#allocation9], %s2078_s30, %s2078_s30, %s2079_s6  }
  0x54   :  { %2068 = dma.done.wait [#allocation3], 512  }
  0x55   :  { %2069 = vsyncadd [#allocation3], 4294966784 }
  0x56   :  { %2070 = dma.done.wait [#allocation6], 1024  }
  0x57   :  { %2071 = vsyncadd [#allocation6], 4294966272 }
  0x58   :  { %2072 = dma.done.wait [#allocation9], 3072  }
  0x59   :  { %2073 = vsyncadd [#allocation9], 4294964224  ;;  %v89_v0 = vld [vmem:[#allocation5] sm:$0xff]  ;;  %v90_v1 = vld [vmem:[#allocation5 + $0x8] sm:$0xff]  ;;  %v2083_v36 = vmov 683565275  }
  0x5a   :  { %v2212_v2 = vmul.f32 6.2831855, %v89_v0  ;;  %v2214_v3 = vmul.f32 6.2831855, %v90_v1  ;;  %v91_v4 = vld [vmem:[#allocation5 + $0x10] sm:$0xff]  ;;  %v92_v20 = vld [vmem:[#allocation5 + $0x18] sm:$0xff] }
  0x5b   :  { %v2216_v5 = vmul.f32 6.2831855, %v91_v4  ;;  %v2228_v26 = vmul.f32 6.2831855, %v92_v20  ;;  %v2084_v38 = vmov 2475754826  }
  0x5c   :  { %v101_v6 = vand.u32 2147483647, %v2212_v2  ;;  %v104_v7 = vand.u32 2139095040, %v2212_v2  ;;  %v204_v8 = vand.u32 2147483647, %v2214_v3  ;;  %v207_v9 = vand.u32 2139095040, %v2214_v3 }
  0x5d   :  { %v310_v14 = vand.u32 2139095040, %v2216_v5  ;;  %v307_v23 = vand.u32 2147483647, %v2216_v5  ;;  %v2085_v40 = vmov 2131351028   ;;  %vm103_vm13 = vcmp.lt.s32.totalorder %v2212_v2, 0 }
  0x5e   :  { %v105_v10 = vshrl.u32 %v104_v7, 23  ;;  %v108_v11 = vand.u32 8388607, %v101_v6  ;;  %v208_v12 = vshrl.u32 %v207_v9, 23  ;;  %v211_v13 = vand.u32 8388607, %v204_v8 }
  0x5f   :  { %v311_v17 = vshrl.u32 %v310_v14, 23  ;;  %v2236_v33 = vand.u32 8388607, %v307_v23  ;;  %v2086_v42 = vmov 2102212464   ;;  %vm206_vm14 = vcmp.lt.s32.totalorder %v2214_v3, 0 }
  0x60   :  { %v1593_v15 = vadd.s32 4294967169, %v105_v10  ;;  %v1597_v16 = vadd.s32 4294967169, %v208_v12  ;;  %v109_v18 = vor.u32 8388608, %v108_v11  ;;  %v212_v21 = vor.u32 8388608, %v211_v13  ;;  %s2089_s4 = smov 32   ;;  %s2090_s28 = smov 96  }
  0x61   :  { %v1601_v24 = vadd.s32 4294967169, %v311_v17  ;;  %v2087_v44 = vmov 920167782   ;;  %v2088_v52 = vmov 1326507024   ;;  %s2092_s7 = smov [#allocation11]  }
  0x62   :  { %v111_v19 = vadd.s32 1, %v1593_v15  ;;  %v214_v22 = vadd.s32 1, %v1597_v16  ;;  %v2230_v29 = vshll.u32 %v109_v18, 8  ;;  %v2232_v32 = vshll.u32 %v212_v21, 8  ;;  %s2091_s3 = smov 1e-30  }
  0x63   :  { %v2238_v34 = vadd.s32 1, %v1601_v24  ;;  %s1579_s8 = sshll.u32 %s2092_s7, 4  ;;  %s1580_s8 = int_to_ptr.vmem [resolvable:$true] %s1579_s8 }
  0x64   :  { %vm112_vm0 = vcmp.gt.s32.totalorder %v111_v19, 0  ;;  %vm215_vm1 = vcmp.gt.s32.totalorder %v214_v22, 0  ;;  %s2046_s10 = scalar_lea.vmem %s1580_s8, 512  ;;  %p2051_p13 = scmp.lt.s32.totalorder %s1580_s8, %s1580_s8 }
  0x65   :  { %v113_v25 = vsel %vm112_vm0, %v111_v19, 0  ;;  %v216_v30 = vsel %vm215_vm1, %v214_v22, 0  ;;  %vm318_vm6 = vcmp.gt.s32.totalorder %v2238_v34, 0  ;;  %vm2342_vm1 = vcmp.le.f32.partialorder %v101_v6, 0.7853982  ;;  %p2047_p12 = scmp.ne.s32.totalorder %s1580_s8, %s2046_s10  ;;  %p2052_p0 = scmp.lt.s32.totalorder %s2046_s10, %s2046_s10 }
  0x66   :  { %v114_v27 = vshrl.u32 %v113_v25, 5  ;;  %v115_v28 = vand.u32 31, %v113_v25  ;;  %v218_v31 = vand.u32 31, %v216_v30  ;;  %v2245_v46 = vshrl.u32 %v216_v30, 5 }
  0x67   :  { %p2053_p1 = por %p2052_p0, %p2051_p13 }
  0x68   :  { %v116_v35 = vsub.s32 32, %v115_v28  ;;  %v118_v37 = vshll.u32 %v2083_v36, %v115_v28  ;;  %v121_v39 = vshll.u32 %v2084_v38, %v115_v28  ;;  %v124_v41 = vshll.u32 %v2085_v40, %v115_v28 }
  0x69   :  { %v127_v43 = vshll.u32 %v2086_v42, %v115_v28  ;;  %v130_v45 = vshll.u32 %v2087_v44, %v115_v28  ;;  %vm133_vm2 = vcmp.lt.s32.totalorder %v114_v27, 1  ;;  %vm134_vm3 = vcmp.lt.s32.totalorder %v114_v27, 2  ;;  %p2054_p2 = pnand %p2053_p1, %p2047_p12 }
  0x6a   :  { %v117_v47 = vshrl.u32 %v2083_v36, %v116_v35  ;;  %v119_v48 = vshrl.u32 %v2084_v38, %v116_v35  ;;  %v122_v49 = vshrl.u32 %v2085_v40, %v116_v35  ;;  %v125_v50 = vshrl.u32 %v2086_v42, %v116_v35 }
  0x6b   :  { %v128_v51 = vshrl.u32 %v2087_v44, %v116_v35  ;;  %v131_v53 = vshrl.u32 %v2088_v52, %v116_v35  ;;  %vm136_vm4 = vcmp.lt.s32.totalorder %v114_v27, 4  ;;  %v219_v57 = vsub.s32 32, %v218_v31 }
  0x6c   :  { %v120_v54 = vor.u32 %v119_v48, %v118_v37  ;;  %v123_v55 = vor.u32 %v122_v49, %v121_v39  ;;  %v126_v56 = vor.u32 %v125_v50, %v124_v41  ;;  %vm135_vm5 = vcmp.lt.s32.totalorder %v114_v27, 3 }
  0x6d   :  { %v129_v58 = vor.u32 %v128_v51, %v127_v43  ;;  %v132_v59 = vor.u32 %v131_v53, %v130_v45  ;;  %v221_v60 = vshll.u32 %v2083_v36, %v218_v31  ;;  %v224_v9 = vshll.u32 %v2084_v38, %v218_v31 }
  0x6e   :  { %v137_v61 = vsel %vm133_vm2, %v117_v47, %v120_v54  ;;  %v138_v62 = vsel %vm136_vm4, %v126_v56, 2102212464  ;;  %v141_v63 = vsel %vm133_vm2, %v120_v54, %v123_v55  ;;  %v145_v0 = vsel %vm133_vm2, %v123_v55, %v126_v56 }
  0x6f   :  { %v139_v1 = vsel %vm135_vm5, %v123_v55, %v138_v62  ;;  %v142_v4 = vsel %vm136_vm4, %v129_v58, 920167782  ;;  %v146_v7 = vsel %vm136_vm4, %v132_v59, 1326507024  ;;  %v220_v12 = vshrl.u32 %v2083_v36, %v219_v57 }
  0x70   :  { %v143_v10 = vsel %vm135_vm5, %v126_v56, %v142_v4  ;;  %v147_v11 = vsel %vm135_vm5, %v129_v58, %v146_v7  ;;  %v222_v13 = vshrl.u32 %v2084_v38, %v219_v57  ;;  %v140_v14 = vsel %vm134_vm3, %v137_v61, %v139_v1 }
  0x71   :  { %v144_v15 = vsel %vm134_vm3, %v141_v63, %v143_v10  ;;  %v148_v16 = vsel %vm134_vm3, %v145_v0, %v147_v11  ;;  %v225_v17 = vshrl.u32 %v2085_v40, %v219_v57  ;;  %v227_v25 = vshll.u32 %v2085_v40, %v218_v31 }
  0x72   :  { %v2266_v18 = vmul.u32.u64.low %v2230_v29, %v148_v16  ;;  %v2267_v19 = vmul.u32.u64.high %v2230_v29, %v148_v16, %v2266_v18  ;;  %v2270_v20 = vmul.u32.u64.low %v2230_v29, %v144_v15  ;;  %v2271_v21 = vmul.u32.u64.high %v2230_v29, %v144_v15, %v2270_v20 }
  0x73   :  { %v223_v22 = vor.u32 %v222_v13, %v221_v60  ;;  %v226_v24 = vor.u32 %v225_v17, %v224_v9  ;;  %v228_v28 = vshrl.u32 %v2086_v42, %v219_v57  ;;  %v230_v27 = vshll.u32 %v2086_v42, %v218_v31 }
  0x74   :  { %v231_v30 = vshrl.u32 %v2087_v44, %v219_v57  ;;  %v233_v35 = vshll.u32 %v2087_v44, %v218_v31  ;;  %v234_v37 = vshrl.u32 %v2088_v52, %v219_v57  ;;  %v156_v39 = vmul.u32 %v2230_v29, %v140_v14 }
  0x75   :  { %v229_v41 = vor.u32 %v228_v28, %v227_v25  ;;  %vm236_vm7 = vcmp.lt.s32.totalorder %v2245_v46, 1  ;;  %vm237_vm8 = vcmp.lt.s32.totalorder %v2245_v46, 2  ;;  %vm158_vm9 = vc.u32 %v2267_v19, %v2270_v20 }
  0x76   :  { %v159_v43 = vadd.s32 1, %v2271_v21  ;;  %v232_v45 = vor.u32 %v231_v30, %v230_v27  ;;  %vm238_vm10 = vcmp.lt.s32.totalorder %v2245_v46, 3  ;;  %v235_v47 = vor.u32 %v234_v37, %v233_v35 }
  0x77   :  { %vm239_vm11 = vcmp.lt.s32.totalorder %v2245_v46, 4  ;;  %v240_v31 = vsel %vm236_vm7, %v220_v12, %v223_v22  ;;  %v244_v48 = vsel %vm236_vm7, %v223_v22, %v226_v24  ;;  %v248_v51 = vsel %vm236_vm7, %v226_v24, %v229_v41 }
  0x78   :  { %v160_v29 = vsel %vm158_vm9, %v159_v43, %v2271_v21  ;;  %v241_v49 = vsel %vm239_vm11, %v229_v41, 2102212464  ;;  %v245_v50 = vsel %vm239_vm11, %v232_v45, 920167782  ;;  %v249_v56 = vsel %vm239_vm11, %v235_v47, 1326507024 }
  0x79   :  { %v161_v53 = vadd.s32 %v160_v29, %v156_v39  ;;  %v242_v54 = vsel %vm238_vm10, %v226_v24, %v241_v49  ;;  %v246_v55 = vsel %vm238_vm10, %v229_v41, %v245_v50  ;;  %v250_v59 = vsel %vm238_vm10, %v232_v45, %v249_v56 }
  0x7a   :  { %v243_v57 = vsel %vm237_vm8, %v240_v31, %v242_v54  ;;  %v247_v58 = vsel %vm237_vm8, %v244_v48, %v246_v55  ;;  %v319_v60 = vsel %vm318_vm6, %v2238_v34, 0  ;;  %v251_v62 = vsel %vm237_vm8, %v248_v51, %v250_v59 }
  0x7b   :  { %v162_v61 = vadd.s32 536870912, %v161_v53  ;;  %v2299_v63 = vmul.u32.u64.low %v2232_v32, %v247_v58  ;;  %v2300_v0 = vmul.u32.u64.high %v2232_v32, %v247_v58, %v2299_v63  ;;  %v315_v9 = vor.u32 8388608, %v2236_v33 }
  0x7c   :  { %v2304_v1 = vmul.u32.u64.low %v2232_v32, %v251_v62  ;;  %v2305_v4 = vmul.u32.u64.high %v2232_v32, %v251_v62, %v2304_v1  ;;  %v321_v10 = vand.u32 31, %v319_v60  ;;  %v413_v11 = vand.u32 2139095040, %v2228_v26 }
  0x7d   :  { %v163_v7 = vshrl.u32 %v162_v61, 30  ;;  %v259_v34 = vmul.u32 %v2232_v32, %v243_v57  ;;  %v262_v46 = vadd.s32 1, %v2300_v0  ;;  %v2313_v14 = vshrl.u32 %v319_v60, 5 }
  0x7e   :  { %v322_v13 = vsub.s32 32, %v321_v10  ;;  %vm261_vm12 = vc.u32 %v2305_v4, %v2299_v63  ;;  %v410_v15 = vand.u32 2147483647, %v2228_v26  ;;  %v2320_v17 = vshll.u32 %v315_v9, 8 }
  0x7f   :  { %v164_v12 = vshll.u32 %v163_v7, 30  ;;  %v263_v33 = vsel %vm261_vm12, %v262_v46, %v2300_v0  ;;  %v414_v32 = vshrl.u32 %v413_v11, 23  ;;  %v324_v21 = vshll.u32 %v2083_v36, %v321_v10 }
  0x80   :  { %v264_v18 = vadd.s32 %v263_v33, %v259_v34  ;;  %v325_v22 = vshrl.u32 %v2084_v38, %v322_v13  ;;  %v327_v24 = vshll.u32 %v2084_v38, %v321_v10  ;;  %v328_v28 = vshrl.u32 %v2085_v40, %v322_v13 }
  0x81   :  { %v2317_v16 = vsub.s32 %v161_v53, %v164_v12  ;;  %v330_v27 = vshll.u32 %v2085_v40, %v321_v10  ;;  %v331_v30 = vshrl.u32 %v2086_v42, %v322_v13  ;;  %v157_v35 = vadd.s32 %v2270_v20, %v2267_v19 }
  0x82   :  { %v265_v37 = vadd.s32 536870912, %v264_v18  ;;  %v333_v39 = vshll.u32 %v2086_v42, %v321_v10  ;;  %vm339_vm15 = vcmp.lt.s32.totalorder %v2313_v14, 1  ;;  %v187_v43 = vsub.s32 4, %v163_v7 }
  0x83   :  { %v167_v25 = vsub.s32 0, %v2317_v16  ;;  %v334_v45 = vshrl.u32 %v2087_v44, %v322_v13  ;;  %vm342_vm0 = vcmp.lt.s32.totalorder %v2313_v14, 4  ;;  %v323_v31 = vshrl.u32 %v2083_v36, %v322_v13 }
  0x84   :  { %v266_v47 = vshrl.u32 %v265_v37, 30  ;;  %v336_v48 = vshll.u32 %v2087_v44, %v321_v10  ;;  %v337_v29 = vshrl.u32 %v2088_v52, %v322_v13  ;;  %vm2348_vm2 = vcmp.le.f32.partialorder %v204_v8, 0.7853982 }
  0x85   :  { %v1594_v41 = vmin.u32 %v167_v25, %v2317_v16  ;;  %v326_v50 = vor.u32 %v325_v22, %v324_v21  ;;  %v329_v51 = vor.u32 %v328_v28, %v327_v24  ;;  %v332_v53 = vor.u32 %v331_v30, %v330_v27 }
  0x86   :  { %v267_v54 = vshll.u32 %v266_v47, 30  ;;  %v290_v55 = vsub.s32 4, %v266_v47  ;;  %v335_v56 = vor.u32 %v334_v45, %v333_v39  ;;  %vm340_vm3 = vcmp.lt.s32.totalorder %v2313_v14, 2 }
  0x87   :  { %v169_v20 = vclz %v1594_v41  ;;  %v338_v6 = vor.u32 %v337_v29, %v336_v48  ;;  %vm341_vm4 = vcmp.lt.s32.totalorder %v2313_v14, 3  ;;  %v344_v58 = vsel %vm342_vm0, %v332_v53, 2102212464 }
  0x88   :  { %v188_v8 = vsel %vm103_vm13, %v187_v43, %v163_v7  ;;  %v2358_v59 = vsub.s32 %v264_v18, %v267_v54  ;;  %v343_v60 = vsel %vm339_vm15, %v323_v31, %v326_v50  ;;  %v348_v61 = vsel %vm342_vm0, %v335_v56, 920167782 }
  0x89   :  { %v1595_v57 = vadd.s32 4294967294, %v169_v20  ;;  %v291_v62 = vsel %vm206_vm14, %v290_v55, %v266_v47  ;;  %v347_v0 = vsel %vm339_vm15, %v326_v50, %v329_v51  ;;  %v351_v1 = vsel %vm339_vm15, %v329_v51, %v332_v53 }
  0x8a   :  { %v270_v7 = vsub.s32 0, %v2358_v59  ;;  %v345_v10 = vsel %vm341_vm4, %v329_v51, %v344_v58  ;;  %v349_v11 = vsel %vm341_vm4, %v332_v53, %v348_v61  ;;  %v352_v13 = vsel %vm342_vm0, %v338_v6, 1326507024 }
  0x8b   :  { %vm1596_vm5 = vcmp.lt.s32.totalorder %v1595_v57, 0  ;;  %v353_v18 = vsel %vm341_vm4, %v335_v56, %v352_v13  ;;  %v1605_v21 = vadd.s32 4294967169, %v414_v32  ;;  %v417_v22 = vand.u32 8388607, %v410_v15 }
  0x8c   :  { %v172_v9 = vsel %vm1596_vm5, 0, %v1595_v57  ;;  %v1598_v33 = vmin.u32 %v270_v7, %v2358_v59  ;;  %v350_v28 = vsel %vm340_vm3, %v347_v0, %v349_v11  ;;  %v190_v27 = vsel %vm2342_vm1, 0, %v188_v8 }
  0x8d   :  { %v173_v34 = vsub.s32 32, %v172_v9  ;;  %v174_v12 = vshll.u32 %v2317_v16, %v172_v9  ;;  %v177_v46 = vsub.s32 4294967266, %v172_v9  ;;  %v354_v16 = vsel %vm340_vm3, %v351_v1, %v353_v18 }
  0x8e   :  { %v272_v30 = vclz %v1598_v33  ;;  %v2391_v37 = vsel %vm2348_vm2, 0, %v291_v62  ;;  %v346_v32 = vsel %vm340_vm3, %v343_v60, %v345_v10  ;;  %v420_v48 = vadd.s32 1, %v1605_v21 }
  0x8f   :  { %v175_v24 = vshrl.u32 %v157_v35, %v173_v34  ;;  %v178_v25 = vadd.s32 127, %v177_v46  ;;  %v2396_v41 = vmul.u32.u64.low %v2320_v17, %v354_v16  ;;  %v2397_v43 = vmul.u32.u64.high %v2320_v17, %v354_v16, %v2396_v41 }
  0x90   :  { %v1599_v45 = vadd.s32 4294967294, %v272_v30  ;;  %v2400_v47 = vmul.u32.u64.low %v2320_v17, %v350_v28  ;;  %v2401_v31 = vmul.u32.u64.high %v2320_v17, %v350_v28, %v2400_v47  ;;  %v260_v50 = vadd.s32 %v2299_v63, %v2305_v4 }
  0x91   :  { %v176_v39 = vor.u32 %v175_v24, %v174_v12  ;;  %v179_v35 = vshll.u32 %v178_v25, 23  ;;  %v610_v51 = vadd.s32 3, %v190_v27  ;;  %v714_v14 = vadd.s32 3, %v2391_v37 }
  0x92   :  { %vm1600_vm6 = vcmp.lt.s32.totalorder %v1599_v45, 0  ;;  %v362_v53 = vmul.u32 %v2320_v17, %v346_v32  ;;  %vm421_vm7 = vcmp.gt.s32.totalorder %v420_v48, 0  ;;  %vm364_vm8 = vc.u32 %v2397_v43, %v2400_v47 }
  0x93   :  { %v180_v29 = vor.u32 4788187, %v179_v35  ;;  %v183_v20 = vcvt.s32.f32 %v176_v39  ;;  %v275_v55 = vsel %vm1600_vm6, 0, %v1599_v45  ;;  %v418_v56 = vor.u32 8388608, %v417_v22 }
  0x94   :  { %v276_v57 = vsub.s32 32, %v275_v55  ;;  %v277_v6 = vshll.u32 %v2358_v59, %v275_v55  ;;  %v280_v58 = vsub.s32 4294967266, %v275_v55  ;;  %v365_v8 = vadd.s32 1, %v2401_v31 }
  0x95   :  { %v181_v54 = vand.u32 2147483647, %v180_v29  ;;  %v2410_v63 = vand.u32 3, %v610_v51  ;;  %v422_v4 = vsel %vm421_vm7, %v420_v48, 0  ;;  %v2412_v0 = vand.u32 3, %v714_v14 }
  0x96   :  { %v278_v61 = vshrl.u32 %v260_v50, %v276_v57  ;;  %v281_v62 = vadd.s32 127, %v280_v58  ;;  %v366_v17 = vsel %vm364_vm8, %v365_v8, %v2401_v31  ;;  %v424_v7 = vand.u32 31, %v422_v4 }
  0x97   :  { %v184_v60 = vmul.f32 %v183_v20, %v181_v54  ;;  %v367_v9 = vadd.s32 %v366_v17, %v362_v53  ;;  %v2415_v10 = vshll.u32 %v418_v56, 8  ;;  %v2418_v34 = vadd.s32 %v2400_v47, %v2397_v43 }
  0x98   :  { %v279_v11 = vor.u32 %v278_v61, %v277_v6  ;;  %v282_v59 = vshll.u32 %v281_v62, 23  ;;  %v2420_v12 = vand.u32 3, %v190_v27  ;;  %v425_v33 = vsub.s32 32, %v424_v7 }
  0x99   :  { %v185_v1 = vxor.u32 2147483648, %v184_v60  ;;  %v368_v13 = vadd.s32 536870912, %v367_v9  ;;  %v427_v18 = vshll.u32 %v2083_v36, %v424_v7  ;;  %v430_v25 = vshll.u32 %v2084_v38, %v424_v7 }
  0x9a   :  { %v283_v22 = vor.u32 4788187, %v282_v59  ;;  %v286_v24 = vcvt.s32.f32 %v279_v11  ;;  %v423_v16 = vshrl.u32 %v422_v4, 5  ;;  %v428_v27 = vshrl.u32 %v2084_v38, %v425_v33 }
  0x9b   :  { %v186_v46 = vsel %vm103_vm13, %v185_v1, %v184_v60  ;;  %v2429_v28 = vshrl.u32 %v368_v13, 30  ;;  %v431_v32 = vshrl.u32 %v2085_v40, %v425_v33  ;;  %v433_v39 = vshll.u32 %v2085_v40, %v424_v7 }
  0x9c   :  { %v189_v21 = vsel %vm2342_vm1, %v2212_v2, %v186_v46  ;;  %v284_v30 = vand.u32 2147483647, %v283_v22  ;;  %vm616_vm9 = vcmp.eq.s32.totalorder %v2410_v63, 2  ;;  %v426_v35 = vshrl.u32 %v2083_v36, %v425_v33 }
  0x9d   :  { %1918 = vcosq.f32 %v189_v21  ;;  %v370_v19 = vshll.u32 %v2429_v28, 30  ;;  %v429_v41 = vor.u32 %v428_v27, %v427_v18  ;;  %v434_v43 = vshrl.u32 %v2086_v42, %v425_v33 }
  0x9e   :  { %1920 = vsinq.f32 %v189_v21  ;;  %v287_v45 = vmul.f32 %v286_v24, %v284_v30  ;;  %vm613_vm10 = vcmp.eq.s32.totalorder %v2410_v63, 0  ;;  %v432_v47 = vor.u32 %v431_v32, %v430_v25 }
  0x9f   :  { %v436_v38 = vshll.u32 %v2086_v42, %v424_v7  ;;  %v437_v31 = vshrl.u32 %v2087_v44, %v425_v33  ;;  %vm612_vm11 = vcmp.lt.s32.totalorder %v2410_v63, 2  ;;  %v2442_v40 = vsub.s32 %v367_v9, %v370_v19 }
  0xa0   :  { %v439_v48 = vshll.u32 %v2087_v44, %v424_v7  ;;  %vm442_vm12 = vcmp.lt.s32.totalorder %v423_v16, 1  ;;  %vm443_vm13 = vcmp.lt.s32.totalorder %v423_v16, 2  ;;  %v288_v36 = vxor.u32 2147483648, %v287_v45 }
  0xa1   :  { %v435_v29 = vor.u32 %v434_v43, %v433_v39  ;;  %v438_v20 = vor.u32 %v437_v31, %v436_v38  ;;  %v440_v50 = vshrl.u32 %v2088_v52, %v425_v33  ;;  %vm193_vm15 = vweird.f32 %v2212_v2 }
  0xa2   :  { %v373_v51 = vsub.s32 0, %v2442_v40  ;;  %vm444_vm0 = vcmp.lt.s32.totalorder %v423_v16, 3  ;;  %vm445_vm1 = vcmp.lt.s32.totalorder %v423_v16, 4  ;;  %v446_v42 = vsel %vm442_vm12, %v426_v35, %v429_v41  ;;  %v97_v35 = vld [vmem:[#allocation2] sm:$0xff] }
  0xa3   :  { %v289_v14 = vsel %vm206_vm14, %v288_v36, %v287_v45  ;;  %v441_v53 = vor.u32 %v440_v50, %v439_v48  ;;  %v447_v44 = vsel %vm445_vm1, %v435_v29, 2102212464  ;;  %v450_v54 = vsel %vm442_vm12, %v429_v41, %v432_v47 }
  0xa4   :  { %v292_v52 = vsel %vm2348_vm2, %v2214_v3, %v289_v14  ;;  %v1602_v55 = vmin.u32 %v373_v51, %v2442_v40  ;;  %v448_v56 = vsel %vm444_vm0, %v432_v47, %v447_v44  ;;  %v451_v57 = vsel %vm445_vm1, %v438_v20, 920167782  ;;  %v98_v14 = vld [vmem:[#allocation2 + $0x8] sm:$0xff] }
  0xa5   :  { %1922 = vcosq.f32 %v292_v52  ;;  %v449_v6 = vsel %vm443_vm13, %v446_v42, %v448_v56  ;;  %v452_v58 = vsel %vm444_vm0, %v435_v29, %v451_v57  ;;  %v454_v8 = vsel %vm442_vm12, %v432_v47, %v435_v29 }
  0xa6   :  { %1924 = vsinq.f32 %v292_v52  ;;  %v375_v4 = vclz %v1602_v55  ;;  %v453_v61 = vsel %vm443_vm13, %v450_v54, %v452_v58  ;;  %v455_v49 = vsel %vm445_vm1, %v441_v53, 1326507024 }
  0xa7   :  { %v1919_v60 = vpop.eup %1918  ;;  %v456_v1 = vsel %vm444_vm0, %v438_v20, %v455_v49  ;;  %v2466_v9 = vmul.u32.u64.low %v2415_v10, %v453_v61  ;;  %v2467_v7 = vmul.u32.u64.high %v2415_v10, %v453_v61, %v2466_v9  ;;  %vm196_vm14 = vcmp.eq.s32.totalorder %v2420_v12, 0 }
  0xa8   :  { %v1921_v62 = vpop.eup %1920  ;;  %v200_v17 = vxor.u32 2147483648, %v1919_v60  ;;  %v1603_v59 = vadd.s32 4294967294, %v375_v4  ;;  %v457_v46 = vsel %vm443_vm13, %v454_v8, %v456_v1  ;;  %vm199_vm2 = vcmp.eq.s32.totalorder %v2420_v12, 2 }
  0xa9   :  { %v197_v11 = vxor.u32 2147483648, %v1921_v62  ;;  %v2475_v33 = vmul.u32.u64.low %v2415_v10, %v457_v46  ;;  %v2476_v18 = vmul.u32.u64.high %v2415_v10, %v457_v46, %v2475_v33  ;;  %v465_v22 = vmul.u32 %v2415_v10, %v449_v6 }
  0xaa   :  { %v618_v13 = vsel %vm616_vm9, %v200_v17, %v1921_v62  ;;  %vm1604_vm3 = vcmp.lt.s32.totalorder %v1603_v59, 0  ;;  %vm195_vm4 = vcmp.lt.s32.totalorder %v2420_v12, 2  ;;  %v468_v16 = vadd.s32 1, %v2467_v7 }
  0xab   :  { %v615_v21 = vsel %vm613_vm10, %v1919_v60, %v197_v11  ;;  %v378_v25 = vsel %vm1604_vm3, 0, %v1603_v59  ;;  %v198_v27 = vsel %vm196_vm14, %v1919_v60, %v197_v11  ;;  %v201_v19 = vsel %vm199_vm2, %v200_v17, %v1921_v62 }
  0xac   :  { %v619_v24 = vsel %vm612_vm11, %v615_v21, %v618_v13  ;;  %v379_v30 = vsub.s32 32, %v378_v25  ;;  %v380_v32 = vshll.u32 %v2442_v40, %v378_v25  ;;  %v383_v39 = vsub.s32 4294967266, %v378_v25 }
  0xad   :  { %vm296_vm5 = vweird.f32 %v2214_v3  ;;  %v620_v10 = vsel %vm193_vm15, nan, %v619_v24  ;;  %vm467_vm6 = vc.u32 %v2476_v18, %v2466_v9  ;;  %v297_v63 = vand.u32 3, %v2391_v37 }
  0xae   :  { %vm716_vm7 = vcmp.lt.s32.totalorder %v2412_v0, 2  ;;  %v381_v41 = vshrl.u32 %v2418_v34, %v379_v30  ;;  %v384_v43 = vadd.s32 127, %v383_v39  ;;  %v469_v45 = vsel %vm467_vm6, %v468_v16, %v2467_v7 }
  0xaf   :  { %v1923_v47 = vpop.eup %1922  ;;  %vm717_vm8 = vcmp.eq.s32.totalorder %v2412_v0, 0  ;;  %vm720_vm9 = vcmp.eq.s32.totalorder %v2412_v0, 2  ;;  %v470_v38 = vadd.s32 %v469_v45, %v465_v22  ;;  %v202_v31 = vsel %vm195_vm4, %v198_v27, %v201_v19 }
  0xb0   :  { %v1925_v40 = vpop.eup %1924  ;;  %v303_v48 = vxor.u32 2147483648, %v1923_v47  ;;  %v2500_v36 = vmul.f32 %v620_v10, %v97_v35  ;;  %v382_v37 = vor.u32 %v381_v41, %v380_v32  ;;  %v385_v29 = vshll.u32 %v384_v43, 23 }
  0xb1   :  { %v300_v20 = vxor.u32 2147483648, %v1925_v40  ;;  %v471_v34 = vadd.s32 536870912, %v470_v38  ;;  %vm298_vm10 = vcmp.lt.s32.totalorder %v297_v63, 2  ;;  %vm299_vm11 = vcmp.eq.s32.totalorder %v297_v63, 0 }
  0xb2   :  { %v722_v50 = vsel %vm720_vm9, %v303_v48, %v1925_v40  ;;  %v386_v51 = vor.u32 4788187, %v385_v29  ;;  %v203_v42 = vsel %vm193_vm15, nan, %v202_v31  ;;  %vm302_vm12 = vcmp.eq.s32.totalorder %v297_v63, 2 }
  0xb3   :  { %v719_v12 = vsel %vm717_vm8, %v1923_v47, %v300_v20  ;;  %v472_v53 = vshrl.u32 %v471_v34, 30  ;;  %v301_v44 = vsel %vm299_vm11, %v1923_v47, %v300_v20  ;;  %v304_v54 = vsel %vm302_vm12, %v303_v48, %v1925_v40 }
  0xb4   :  { %v723_v52 = vsel %vm716_vm7, %v719_v12, %v722_v50  ;;  %v387_v55 = vand.u32 2147483647, %v386_v51  ;;  %v389_v56 = vcvt.s32.f32 %v382_v37  ;;  %v305_v57 = vsel %vm298_vm10, %v301_v44, %v304_v54 }
  0xb5   :  { %v724_v6 = vsel %vm296_vm5, nan, %v723_v52  ;;  %v473_v58 = vshll.u32 %v472_v53, 30  ;;  %v306_v2 = vsel %vm296_vm5, nan, %v305_v57  ;;  %v2512_v8 = vmul.f32 %v203_v42, %v97_v35 }
  0xb6   :  { %v2514_v60 = vmul.f32 %v724_v6, %v98_v14  ;;  %v2516_v4 = vmul.f32 %v306_v2, %v98_v14  ;;  %v390_v49 = vmul.f32 %v389_v56, %v387_v55  ;;  %vm309_vm13 = vcmp.lt.s32.totalorder %v2216_v5, 0  ;;  %v99_v56 = vld [vmem:[#allocation2 + $0x10] sm:$0xff] }
  0xb7   :  { %v474_v61 = vsub.s32 %v470_v38, %v473_v58  ;;  %vm2527_vm15 = vcmp.le.f32.partialorder %v307_v23, 0.7853982  ;;  %v466_v13 = vadd.s32 %v2466_v9, %v2476_v18  ;;  %v393_v25 = vsub.s32 4, %v2429_v28 }
  0xb8   :  { %v1878_v0 = vpack.i.bf16 %v2514_v60, %v2500_v36  ;;  %v1888_v17 = vpack.i.bf16 %v2516_v4, %v2512_v8  ;;  %v391_v1 = vxor.u32 2147483648, %v390_v49  ;;  %v496_v19 = vsub.s32 4, %v472_v53 }
  0xb9   :  { %v476_v62 = vsub.s32 0, %v474_v61  ;;  %v394_v9 = vsel %vm309_vm13, %v393_v25, %v2429_v28  ;;  %vm412_vm1 = vcmp.lt.s32.totalorder %v2228_v26, 0  ;;  %vm411_vm14 = vcmp.le.f32.partialorder %v410_v15, 0.7853982 }
  0xba   :  { %1879 = vrot.lane.b32.xlu0 %v1878_v0, %s2089_s4  ;;  %1889 = vrot.lane.b32.xlu1 %v1888_v17, %s2089_s4  ;;  %v392_v46 = vsel %vm309_vm13, %v391_v1, %v390_v49  ;;  %v396_v35 = vsel %vm2527_vm15, 0, %v394_v9  ;;  %v497_v41 = vsel %vm412_vm1, %v496_v19, %v472_v53  ;;  %vm399_vm8 = vweird.f32 %v2216_v5  ;;  %v947_v9 = vld [vmem:[#allocation8 + $0x30] sm:$0xff] }
  0xbb   :  { %v1606_v3 = vmin.u32 %v476_v62, %v474_v61  ;;  %v395_v23 = vsel %vm2527_vm15, %v2216_v5, %v392_v46  ;;  %v818_v43 = vadd.s32 3, %v396_v35  ;;  %v499_v28 = vsel %vm411_vm14, 0, %v497_v41  ;;  %v100_v5 = vld [vmem:[#allocation2 + $0x18] sm:$0xff] }
  0xbc   :  { %1926 = vcosq.f32 %v395_v23  ;;  %v400_v37 = vand.u32 3, %v396_v35  ;;  %v922_v29 = vadd.s32 3, %v499_v28  ;;  %v503_v50 = vand.u32 3, %v499_v28 }
  0xbd   :  { %v478_v7 = vclz %v1606_v3  ;;  %1928 = vsinq.f32 %v395_v23  ;;  %v819_v48 = vand.u32 3, %v818_v43  ;;  %v944_v23 = vld [vmem:[#allocation8 + $0x18] sm:$0xff]  ;;  %v989_v19 = vsub.f32 0.0, %v2514_v60 }
  0xbe   :  { %vm402_vm4 = vcmp.eq.s32.totalorder %v400_v37, 0  ;;  %vm405_vm5 = vcmp.eq.s32.totalorder %v400_v37, 2  ;;  %v923_v15 = vand.u32 3, %v922_v29  ;;  %vm401_vm7 = vcmp.lt.s32.totalorder %v400_v37, 2 }
  0xbf   :  { %v1607_v11 = vadd.s32 4294967294, %v478_v7  ;;  %vm821_vm2 = vcmp.eq.s32.totalorder %v819_v48, 0  ;;  %vm824_vm3 = vcmp.eq.s32.totalorder %v819_v48, 2  ;;  %vm820_vm6 = vcmp.lt.s32.totalorder %v819_v48, 2 }
  0xc0   :  { %vm928_vm9 = vcmp.eq.s32.totalorder %v923_v15, 2  ;;  %vm508_vm10 = vcmp.eq.s32.totalorder %v503_v50, 2  ;;  %vm925_vm11 = vcmp.eq.s32.totalorder %v923_v15, 0  ;;  %vm504_vm12 = vcmp.lt.s32.totalorder %v503_v50, 2 }
  0xc1   :  { %vm1608_vm0 = vcmp.lt.s32.totalorder %v1607_v11, 0  ;;  %vm505_vm13 = vcmp.eq.s32.totalorder %v503_v50, 0  ;;  %vm924_vm15 = vcmp.lt.s32.totalorder %v923_v15, 2  ;;  %v988_v35 = vsub.f32 0.0, %v2500_v36 }
  0xc2   :  { %v481_v33 = vsel %vm1608_vm0, 0, %v1607_v11  ;;  %vm502_vm0 = vweird.f32 %v2228_v26 }
  0xc3   :  { %v482_v21 = vsub.s32 32, %v481_v33  ;;  %v483_v22 = vshll.u32 %v474_v61, %v481_v33  ;;  %v486_v24 = vsub.s32 4294967266, %v481_v33 }
  0xc5   :  { %v484_v16 = vshrl.u32 %v466_v13, %v482_v21  ;;  %v487_v27 = vadd.s32 127, %v486_v24  ;;  %v941_v21 = vld [vmem:[#allocation8] sm:$0xff]  ;;  %v943_v24 = vld [vmem:[#allocation8 + $0x10] sm:$0xff] }
  0xc6   :  { %v1927_v47 = vpop.eup %1926 }
  0xc7   :  { %v485_v30 = vor.u32 %v484_v16, %v483_v22  ;;  %v488_v32 = vshll.u32 %v487_v27, 23  ;;  %v1929_v31 = vpop.eup %1928  ;;  %v406_v34 = vxor.u32 2147483648, %v1927_v47  ;;  %v942_v22 = vld [vmem:[#allocation8 + $0x8] sm:$0xff]  ;;  %v1797_v16 = vpack.c.bf16 %v944_v23, %v943_v24  ;;  %v945_v27 = vld [vmem:[#allocation8 + $0x20] sm:$0xff] }
  0xc8   :  { %v403_v20 = vxor.u32 2147483648, %v1929_v31  ;;  %v1793_v25 = vpack.c.bf16 %v942_v22, %v941_v21 }
  0xc9   :  { %v489_v18 = vor.u32 4788187, %v488_v32  ;;  %v492_v39 = vcvt.s32.f32 %v485_v30  ;;  %v826_v42 = vsel %vm824_vm3, %v406_v34, %v1929_v31  ;;  %v407_v12 = vsel %vm405_vm5, %v406_v34, %v1929_v31  ;;  %v946_v30 = vld [vmem:[#allocation8 + $0x28] sm:$0xff] }
  0xca   :  { %v823_v51 = vsel %vm821_vm2, %v1927_v47, %v403_v20  ;;  %v404_v14 = vsel %vm402_vm4, %v1927_v47, %v403_v20  ;;  %1794 = vmatprep.subr.bf16.mxu1 %v1793_v25  ;;  %v1801_v32 = vpack.c.bf16 %v946_v30, %v945_v27 }
  0xcb   :  { %v490_v10 = vand.u32 2147483647, %v489_v18  ;;  %v827_v53 = vsel %vm820_vm6, %v823_v51, %v826_v42  ;;  %v408_v44 = vsel %vm401_vm7, %v404_v14, %v407_v12  ;;  %1796 = vmatpush3.bf16.msra.mxu1 %v1793_v25  ;;  %v948_v18 = vld [vmem:[#allocation8 + $0x38] sm:$0xff] }
  0xcc   :  { %v828_v6 = vsel %vm399_vm8, nan, %v827_v53  ;;  %v409_v58 = vsel %vm399_vm8, nan, %v408_v44  ;;  %1798 = vmatprep.subr.bf16.mxu1 %v1797_v16  ;;  %v2572_v44 = vld [vmem:[#allocation7 + $0x8] sm:$0xff] }
  0xcd   :  { %v493_v63 = vmul.f32 %v492_v39, %v490_v10  ;;  %v2550_v17 = vmul.f32 %v828_v6, %v99_v56  ;;  %v515_v1 = vmul.f32 %v409_v58, %v99_v56  ;;  %v1805_v39 = vpack.c.bf16 %v948_v18, %v947_v9  ;;  %v2588_v56 = vld [vmem:[#allocation10] sm:$0xff]  ;;  %v2596_v6 = vld [vmem:[#allocation10 + $0x10] sm:$0xff]  ;;  %v964_v58 = vld [vmem:[#allocation10 + $0x28] sm:$0xff] }
  0xcf   :  { %v494_v45 = vxor.u32 2147483648, %v493_v63  ;;  %1800 = vmatpush3.bf16.msra.mxu1 %v1797_v16  ;;  %v990_v37 = vsub.f32 0.0, %v2550_v17 }
  0xd0   :  { %1802 = vmatprep.subr.bf16.mxu1 %v1801_v32 }
  0xd1   :  { %v495_v38 = vsel %vm412_vm1, %v494_v45, %v493_v63  ;;  %vm1012_vm1 = vcmask 523264  }
  0xd2   :  { %v498_v40 = vsel %vm411_vm14, %v2228_v26, %v495_v38  ;;  %v2555_v26 = vld [vmem:[#allocation7] sm:$0xff]  ;;  %vm983_vm14 = vcmask 261120  }
  0xd3   :  { %1930 = vcosq.f32 %v498_v40  ;;  %1705 = vmatprep.mubr.msk.f32.mxu0 %vm1012_vm1, %v2555_v26  ;;  %1804 = vmatpush3.bf16.msra.mxu1 %v1801_v32 }
  0xd4   :  { %1932 = vsinq.f32 %v498_v40  ;;  %1806 = vmatprep.subr.bf16.mxu1 %v1805_v39 }
  0xd7   :  { %1808 = vmatpush3.bf16.msra.mxu1 %v1805_v39 }
  0xdd   :  { %v1931_v54 = vpop.eup %1930 }
  0xde   :  { %v1933_v52 = vpop.eup %1932  ;;  %v509_v55 = vxor.u32 2147483648, %v1931_v54 }
  0xdf   :  { %v506_v57 = vxor.u32 2147483648, %v1933_v52 }
  0xe0   :  { %v930_v2 = vsel %vm928_vm9, %v509_v55, %v1933_v52  ;;  %v510_v61 = vsel %vm508_vm10, %v509_v55, %v1933_v52  ;;  %v2580_v52 = vld [vmem:[#allocation7 + $0x18] sm:$0xff]  ;;  %v2586_v55 = vld [vmem:[#allocation10 + $0x8] sm:$0xff] }
  0xe1   :  { %v927_v0 = vsel %vm925_vm11, %v1931_v54, %v506_v57  ;;  %v507_v49 = vsel %vm505_vm13, %v1931_v54, %v506_v57  ;;  %v2574_v54 = vld [vmem:[#allocation7 + $0x10] sm:$0xff]  ;;  %v2594_v57 = vld [vmem:[#allocation10 + $0x18] sm:$0xff] }
  0xe2   :  { %v931_v62 = vsel %vm924_vm15, %v927_v0, %v930_v2  ;;  %v511_v3 = vsel %vm504_vm12, %v507_v49, %v510_v61  ;;  %v963_v2 = vld [vmem:[#allocation10 + $0x20] sm:$0xff]  ;;  %v966_v61 = vld [vmem:[#allocation10 + $0x38] sm:$0xff] }
  0xe3   :  { %v932_v7 = vsel %vm502_vm0, nan, %v931_v62  ;;  %v512_v11 = vsel %vm502_vm0, nan, %v511_v3 }
  0xe4   :  { %v936_v59 = vmul.f32 %v932_v7, %v100_v5  ;;  %v516_v46 = vmul.f32 %v512_v11, %v100_v5  ;;  %v965_v5 = vld [vmem:[#allocation10 + $0x30] sm:$0xff] }
  0xe6   :  { %v1883_v13 = vpack.i.bf16 %v936_v59, %v2550_v17  ;;  %v1893_v33 = vpack.i.bf16 %v516_v46, %v515_v1  ;;  %v991_v36 = vsub.f32 0.0, %v936_v59 }
  0xe8   :  { %1884 = vrot.lane.b32.xlu0 %v1883_v13, %s2089_s4  ;;  %1894 = vrot.lane.b32.xlu1 %v1893_v33, %s2089_s4 }
  0xec   :  { %1261 = vrot.lane.b32.xlu1 %v2586_v55, %s2089_s4  ;;  %1259 = vrot.lane.b32.xlu0 %v2588_v56, %s2089_s4 }
  0xf0   :  { %1265 = vrot.lane.b32.xlu1 %v2594_v57, %s2089_s4  ;;  %1263 = vrot.lane.b32.xlu0 %v2596_v6, %s2089_s4 }
  0xf4   :  { %1217 = vrot.lane.b32.xlu1 %v964_v58, %s2089_s4  ;;  %1215 = vrot.lane.b32.xlu0 %v963_v2, %s2089_s4 }
  0xf8   :  { %1221 = vrot.lane.b32.xlu1 %v966_v61, %s2089_s4  ;;  %1219 = vrot.lane.b32.xlu0 %v965_v5, %s2089_s4 }
 0x12c   :  { %v1880_v10 = vpop.permute.xlu0 %1879  ;;  %v1890_v43 = vpop.permute.xlu1 %1889 }
 0x12d   :  { %v1882_v63 = vunpack.i.h.bf16 %v1880_v10  ;;  %v1881_v41 = vunpack.i.l.bf16 %v1880_v10  ;;  %v1892_v45 = vunpack.i.h.bf16 %v1890_v43  ;;  %v1891_v47 = vunpack.i.l.bf16 %v1890_v43 }
 0x12f   :  { %v984_v38 = vsel %vm983_vm14, %v2512_v8, %v1881_v41  ;;  %v985_v28 = vsel %vm983_vm14, %v2516_v4, %v1882_v63  ;;  %v1008_v40 = vsel %vm983_vm14, %v988_v35, %v1891_v47  ;;  %v1009_v60 = vsel %vm983_vm14, %v989_v19, %v1892_v45 }
 0x130   :  { %v1777_v31 = vpack.c.bf16 %v985_v28, %v984_v38  ;;  %v1785_v48 = vpack.c.bf16 %v1009_v60, %v1008_v40 }
 0x132   :  { %1778 = vmatprep.subr.bf16.mxu0 %v1777_v31 }
 0x133   :  { %1780 = vmatpush3.bf16.msra.mxu0 %v1777_v31 }
 0x15a   :  { %v1885_v29 = vpop.permute.xlu0 %1884  ;;  %v1895_v20 = vpop.permute.xlu1 %1894 }
 0x15b   :  { %v1887_v34 = vunpack.i.h.bf16 %v1885_v29  ;;  %v1886_v15 = vunpack.i.l.bf16 %v1885_v29  ;;  %v1897_v50 = vunpack.i.h.bf16 %v1895_v20  ;;  %v1896_v8 = vunpack.i.l.bf16 %v1895_v20 }
 0x15d   :  { %v986_v51 = vsel %vm983_vm14, %v515_v1, %v1886_v15  ;;  %v987_v4 = vsel %vm983_vm14, %v516_v46, %v1887_v34  ;;  %v1010_v42 = vsel %vm983_vm14, %v990_v37, %v1896_v8  ;;  %v1011_v14 = vsel %vm983_vm14, %v991_v36, %v1897_v50 }
 0x15e   :  { %v1781_v12 = vpack.c.bf16 %v987_v4, %v986_v51  ;;  %v1789_v53 = vpack.c.bf16 %v1011_v14, %v1010_v42  ;;  %v1262_v3 = vpop.permute.xlu1 %1261  ;;  %v1260_v1 = vpop.permute.xlu0 %1259 }
 0x160   :  { %1782 = vmatprep.subr.bf16.mxu0 %v1781_v12 }
 0x161   :  { %1784 = vmatpush3.bf16.msra.mxu0 %v1781_v12 }
 0x162   :  { %1786 = vmatprep.subr.bf16.mxu0 %v1785_v48  ;;  %v1266_v7 = vpop.permute.xlu1 %1265  ;;  %v1264_v11 = vpop.permute.xlu0 %1263 }
 0x165   :  { %1788 = vmatpush3.bf16.msra.mxu0 %v1785_v48 }
 0x166   :  { %1790 = vmatprep.subr.bf16.mxu0 %v1789_v53  ;;  %v1216_v22 = vpop.permute.xlu0 %1215 }
 0x169   :  { %1792 = vmatpush3.bf16.msra.mxu0 %v1789_v53 }
 0x16a   :  { %v1220_v32 = vpop.permute.xlu0 %1219 }
 0x16c   :  { %1706 = vmatmul.mubr.msk.f32.vlgmr.msra.gmra.mrb[0].mxu0 %vm1012_vm1, %v2572_v44 }
 0x16d   :  { %1708 = vmatprep.mubr.msk.f32.mxu0 %vm1012_vm1, %v2574_v54 }
 0x170   :  { %1709 = vmatmul.mubr.msk.f32.gmra.mrb[2].mxu0 %vm1012_vm1, %v2580_v52 }
 0x171   :  { %1749 = vmatprep.mubr.msk.f32.mxu0 %vm1012_vm1, %v2555_v26  ;;  %v1218_v26 = vpop.permute.xlu1 %1217 }
 0x175   :  { %v1222_v27 = vpop.permute.xlu1 %1221 }
 0x23f   :  { %v1707_v0 = vpop.f32.mrb[0].mxu0 }
 0x240   :  { %v1091_v49 = vpop.f32.mrb[1].mxu0 }
 0x241   :  { %1727 = vmatprep.mubr.msk.f32.mxu1 %vm1012_vm1, %v1091_v49 }
 0x242   :  { %1728 = vmatmul.mubr.msk.f32.vlgmr.msra.gmra.mrb[0].mxu1 %vm1012_vm1, %v1707_v0 }
 0x243   :  { %v1710_v62 = vpop.f32.mrb[2].mxu0 }
 0x244   :  { %v1101_v17 = vpop.f32.mrb[3].mxu0 }
 0x245   :  { %1730 = vmatprep.mubr.msk.f32.mxu1 %vm1012_vm1, %v1101_v17  ;;  %v955_v17 = vld [vmem:[#allocation8 + $0x68] sm:$0xff] }
 0x246   :  { %1731 = vmatmul.mubr.msk.f32.gmra.mrb[2].mxu1 %vm1012_vm1, %v1710_v62  ;;  %v954_v62 = vld [vmem:[#allocation8 + $0x60] sm:$0xff] }
 0x315   :  { %v1729_v59 = vpop.f32.mrb[0].mxu1 }
 0x316   :  { %v1188_v46 = vpop.f32.mrb[1].mxu1  ;;  %v1272_v13 = vmul.f32 %v1729_v59, %v1262_v3  ;;  %v1228_v16 = vmul.f32 %v1729_v59, %v1218_v26  ;;  %v1252_v39 = vmul.f32 %v1729_v59, %v964_v58  ;;  %v1208_v60 = vmul.f32 %v1729_v59, %v2586_v55  ;;  %v956_v3 = vld [vmem:[#allocation8 + $0x70] sm:$0xff] }
 0x317   :  { %v1271_v33 = vmul.f32 %v1260_v1, %v1188_v46  ;;  %v1227_v30 = vmul.f32 %v1216_v22, %v1188_v46  ;;  %v1251_v35 = vmul.f32 %v1188_v46, %v963_v2  ;;  %v1207_v37 = vmul.f32 %v1188_v46, %v2588_v56  ;;  %v950_v2 = vld [vmem:[#allocation8 + $0x40] sm:$0xff]  ;;  %v957_v1 = vld [vmem:[#allocation8 + $0x78] sm:$0xff] }
 0x318   :  { %1281 = vrot.lane.b32.xlu1 %v1272_v13, %s2090_s28 }
 0x319   :  { %1279 = vrot.lane.b32.xlu0 %v1271_v33, %s2090_s28  ;;  %v1732_v21 = vpop.f32.mrb[2].mxu1 }
 0x31a   :  { %v1198_v24 = vpop.f32.mrb[3].mxu1  ;;  %v1274_v25 = vmul.f32 %v1732_v21, %v1266_v7  ;;  %v1230_v9 = vmul.f32 %v1732_v21, %v1222_v27  ;;  %v1254_v43 = vmul.f32 %v1732_v21, %v966_v61  ;;  %v1210_v50 = vmul.f32 %v1732_v21, %v2594_v57  ;;  %v951_v61 = vld [vmem:[#allocation8 + $0x48] sm:$0xff]  ;;  %v953_v57 = vld [vmem:[#allocation8 + $0x58] sm:$0xff] }
 0x31b   :  { %v1273_v23 = vmul.f32 %v1264_v11, %v1198_v24  ;;  %v1229_v18 = vmul.f32 %v1220_v32, %v1198_v24  ;;  %v1253_v38 = vmul.f32 %v1198_v24, %v965_v5  ;;  %v1209_v4 = vmul.f32 %v1198_v24, %v2596_v6  ;;  %v952_v5 = vld [vmem:[#allocation8 + $0x50] sm:$0xff] }
 0x31c   :  { %1285 = vrot.lane.b32.xlu1 %v1274_v25, %s2090_s28  ;;  %v1825_v0 = vpack.c.bf16 %v951_v61, %v950_v2  ;;  %v1829_v49 = vpack.c.bf16 %v953_v57, %v952_v5  ;;  %v1833_v6 = vpack.c.bf16 %v955_v17, %v954_v62  ;;  %v1837_v7 = vpack.c.bf16 %v957_v1, %v956_v3 }
 0x31d   :  { %1283 = vrot.lane.b32.xlu0 %v1273_v23, %s2090_s28 }
 0x31e   :  { %1826 = vmatprep.subr.bf16.mxu1 %v1825_v0 }
 0x31f   :  { %1828 = vmatpush3.bf16.msra.mxu1 %v1825_v0 }
 0x320   :  { %1237 = vrot.lane.b32.xlu1 %v1228_v16, %s2090_s28  ;;  %1830 = vmatprep.subr.bf16.mxu1 %v1829_v49 }
 0x321   :  { %1235 = vrot.lane.b32.xlu0 %v1227_v30, %s2090_s28 }
 0x323   :  { %1832 = vmatpush3.bf16.msra.mxu1 %v1829_v49 }
 0x324   :  { %1241 = vrot.lane.b32.xlu1 %v1230_v9, %s2090_s28  ;;  %1834 = vmatprep.subr.bf16.mxu1 %v1833_v6 }
 0x325   :  { %1239 = vrot.lane.b32.xlu0 %v1229_v18, %s2090_s28 }
 0x327   :  { %1836 = vmatpush3.bf16.msra.mxu1 %v1833_v6 }
 0x328   :  { %1838 = vmatprep.subr.bf16.mxu1 %v1837_v7 }
 0x32b   :  { %1840 = vmatpush3.bf16.msra.mxu1 %v1837_v7 }
 0x38a   :  { %v1282_v19 = vpop.permute.xlu1 %1281 }
 0x38b   :  { %v2618_v10 = vadd.f32 %v1282_v19, %v1252_v39  ;;  %v1280_v63 = vpop.permute.xlu0 %1279 }
 0x38c   :  { %v2620_v41 = vadd.f32 %v1280_v63, %v1251_v35 }
 0x38e   :  { %v1898_v45 = vpack.i.bf16 %v2618_v10, %v2620_v41  ;;  %v1286_v47 = vpop.permute.xlu1 %1285 }
 0x38f   :  { %v2624_v28 = vadd.f32 %v1286_v47, %v1254_v43  ;;  %v1284_v31 = vpop.permute.xlu0 %1283 }
 0x390   :  { %v2626_v40 = vadd.f32 %v1284_v31, %v1253_v38  ;;  %1899 = vrot.lane.b32.xlu0 %v1898_v45, %s2089_s4 }
 0x392   :  { %v1903_v48 = vpack.i.bf16 %v2624_v28, %v2626_v40  ;;  %v1238_v36 = vpop.permute.xlu1 %1237 }
 0x393   :  { %v1248_v29 = vsub.f32 %v1208_v60, %v1238_v36  ;;  %v1236_v20 = vpop.permute.xlu0 %1235 }
 0x394   :  { %v1247_v34 = vsub.f32 %v1207_v37, %v1236_v20  ;;  %1904 = vrot.lane.b32.xlu1 %v1903_v48, %s2089_s4 }
 0x395   :  { %v1316_v15 = vsub.f32 0.0, %v1248_v29 }
 0x396   :  { %v1315_v8 = vsub.f32 0.0, %v1247_v34  ;;  %v1242_v51 = vpop.permute.xlu1 %1241 }
 0x397   :  { %v1250_v42 = vsub.f32 %v1210_v50, %v1242_v51  ;;  %v1240_v14 = vpop.permute.xlu0 %1239 }
 0x398   :  { %v1249_v12 = vsub.f32 %v1209_v4, %v1240_v14  ;;  %v1908_v53 = vpack.i.bf16 %v1316_v15, %v1315_v8 }
 0x399   :  { %v1318_v55 = vsub.f32 0.0, %v1250_v42 }
 0x39a   :  { %v1317_v58 = vsub.f32 0.0, %v1249_v12  ;;  %1909 = vrot.lane.b32.xlu0 %v1908_v53, %s2089_s4 }
 0x39c   :  { %v1913_v56 = vpack.i.bf16 %v1318_v55, %v1317_v58 }
 0x39e   :  { %1914 = vrot.lane.b32.xlu1 %v1913_v56, %s2089_s4 }
 0x402   :  { %v1900_v11 = vpop.permute.xlu0 %1899 }
 0x403   :  { %v1902_v59 = vunpack.i.h.bf16 %v1900_v11  ;;  %v1901_v46 = vunpack.i.l.bf16 %v1900_v11 }
 0x405   :  { %v1311_v13 = vsel %vm983_vm14, %v1247_v34, %v1901_v46  ;;  %v1312_v33 = vsel %vm983_vm14, %v1248_v29, %v1902_v59 }
 0x406   :  { %v1905_v26 = vpop.permute.xlu1 %1904  ;;  %v1809_v21 = vpack.c.bf16 %v1312_v33, %v1311_v13 }
 0x407   :  { %v1907_v22 = vunpack.i.h.bf16 %v1905_v26  ;;  %v1906_v24 = vunpack.i.l.bf16 %v1905_v26 }
 0x408   :  { %1810 = vmatprep.subr.bf16.mxu0 %v1809_v21 }
 0x409   :  { %1812 = vmatpush3.bf16.msra.mxu0 %v1809_v21  ;;  %v1313_v25 = vsel %vm983_vm14, %v1249_v12, %v1906_v24  ;;  %v1314_v23 = vsel %vm983_vm14, %v1250_v42, %v1907_v22 }
 0x40a   :  { %v1813_v16 = vpack.c.bf16 %v1314_v23, %v1313_v25 }
 0x40c   :  { %v1910_v27 = vpop.permute.xlu0 %1909  ;;  %1814 = vmatprep.subr.bf16.mxu0 %v1813_v16 }
 0x40d   :  { %v1912_v30 = vunpack.i.h.bf16 %v1910_v27  ;;  %v1911_v32 = vunpack.i.l.bf16 %v1910_v27  ;;  %1816 = vmatpush3.bf16.msra.mxu0 %v1813_v16 }
 0x40f   :  { %v1335_v9 = vsel %vm983_vm14, %v2620_v41, %v1911_v32  ;;  %v1336_v18 = vsel %vm983_vm14, %v2618_v10, %v1912_v30 }
 0x410   :  { %v1915_v39 = vpop.permute.xlu1 %1914  ;;  %v1817_v19 = vpack.c.bf16 %v1336_v18, %v1335_v9 }
 0x411   :  { %v1917_v35 = vunpack.i.h.bf16 %v1915_v39  ;;  %v1916_v63 = vunpack.i.l.bf16 %v1915_v39 }
 0x412   :  { %1818 = vmatprep.subr.bf16.mxu0 %v1817_v19 }
 0x413   :  { %1820 = vmatpush3.bf16.msra.mxu0 %v1817_v19  ;;  %v1337_v43 = vsel %vm983_vm14, %v2626_v40, %v1916_v63  ;;  %v1338_v45 = vsel %vm983_vm14, %v2624_v28, %v1917_v35 }
 0x414   :  { %v1821_v47 = vpack.c.bf16 %v1338_v45, %v1337_v43 }
 0x416   :  { %1822 = vmatprep.subr.bf16.mxu0 %v1821_v47 }
 0x417   :  { %1824 = vmatpush3.bf16.msra.mxu0 %v1821_v47 }
 0x41a   :  { %1750 = vmatmul.mubr.msk.f32.vlgmr.msra.gmra.mrb[4].mxu0 %vm1012_vm1, %v2572_v44 }
 0x41b   :  { %1752 = vmatprep.mubr.msk.f32.mxu0 %vm1012_vm1, %v2574_v54 }
 0x41e   :  { %1753 = vmatmul.mubr.msk.f32.gmra.mrb[6].mxu0 %vm1012_vm1, %v2580_v52 }
 0x4ed   :  { %v1751_v10 = vpop.f32.mrb[4].mxu0 }
 0x4ee   :  { %v1405_v41 = vpop.f32.mrb[5].mxu0 }
 0x4ef   :  { %1771 = vmatprep.mubr.msk.f32.mxu1 %vm1012_vm1, %v1405_v41 }
 0x4f0   :  { %1772 = vmatmul.mubr.msk.f32.vlgmr.msra.gmra.mrb[4].mxu1 %vm1012_vm1, %v1751_v10 }
 0x4f1   :  { %v1754_v38 = vpop.f32.mrb[6].mxu0 }
 0x4f2   :  { %v1415_v28 = vpop.f32.mrb[7].mxu0 }
 0x4f3   :  { %1774 = vmatprep.mubr.msk.f32.mxu1 %vm1012_vm1, %v1415_v28 }
 0x4f4   :  { %1775 = vmatmul.mubr.msk.f32.gmra.mrb[6].mxu1 %vm1012_vm1, %v1754_v38 }
 0x5c3   :  { %v1773_v31 = vpop.f32.mrb[4].mxu1 }
 0x5c4   :  { %v1522_v44 = vmul.f32 %v1773_v31, %v1773_v31  ;;  %v1502_v40 = vpop.f32.mrb[5].mxu1 }
 0x5c5   :  { %v1521_v60 = vmul.f32 %v1502_v40, %v1502_v40 }
 0x5c6   :  { %1531 = vrot.lane.b32.xlu1 %v1522_v44, %s2090_s28 }
 0x5c7   :  { %1529 = vrot.lane.b32.xlu0 %v1521_v60, %s2090_s28  ;;  %v1776_v54 = vpop.f32.mrb[6].mxu1 }
 0x5c8   :  { %v1524_v52 = vmul.f32 %v1776_v54, %v1776_v54  ;;  %v1512_v48 = vpop.f32.mrb[7].mxu1 }
 0x5c9   :  { %v1523_v36 = vmul.f32 %v1512_v48, %v1512_v48 }
 0x5ca   :  { %1535 = vrot.lane.b32.xlu1 %v1524_v52, %s2090_s28 }
 0x5cb   :  { %1533 = vrot.lane.b32.xlu0 %v1523_v36, %s2090_s28 }
 0x638   :  { %v1532_v37 = vpop.permute.xlu1 %1531 }
 0x639   :  { %v1530_v29 = vpop.permute.xlu0 %1529  ;;  %v1542_v20 = vadd.f32 %v1532_v37, %v1522_v44 }
 0x63a   :  { %v1541_v34 = vadd.f32 %v1530_v29, %v1521_v60 }
 0x63b   :  { %v1546_v51 = vsel %vm983_vm14, %v1542_v20, -inf }
 0x63c   :  { %v1536_v15 = vpop.permute.xlu1 %1535  ;;  %v1545_v4 = vsel %vm983_vm14, %v1541_v34, -inf }
 0x63d   :  { %v1544_v50 = vadd.f32 %v1536_v15, %v1524_v52  ;;  %v1534_v8 = vpop.permute.xlu0 %1533  ;;  %v1549_v53 = vmax.f32 %v1545_v4, %v1546_v51 }
 0x63e   :  { %v1543_v42 = vadd.f32 %v1534_v8, %v1523_v36 }
 0x63f   :  { %v1548_v14 = vsel %vm983_vm14, %v1544_v50, -inf }
 0x640   :  { %v1547_v12 = vsel %vm983_vm14, %v1543_v42, -inf }
 0x641   :  { %v1550_v55 = vmax.f32 %v1547_v12, %v1548_v14 }
 0x643   :  { %v1551_v58 = vmax.f32 %v1549_v53, %v1550_v55 }
 0x645   :  { %1552 = vmax.xlane.f32.xlu0 %v1551_v58 }
 0x6d2   :  { %v1553_v56 = vpop.xlane.xlu0 %1552 }
 0x6d3   :  { %v1554_v2 = vrot.slane %v1553_v56, 4 }
 0x6d5   :  { %v1555_v61 = vmax.f32 %v1553_v56, %v1554_v2 }
 0x6d7   :  { %v1556_v5 = vrot.slane %v1555_v61, 2 }
 0x6d9   :  { %v1557_v0 = vmax.f32 %v1555_v61, %v1556_v5 }
 0x6db   :  { %v1558_v57 = vrot.slane %v1557_v0, 1 }
 0x6dd   :  { %v1559_v49 = vmax.f32 %v1557_v0, %v1558_v57 }
 0x6df   :  { %1857 = vpush %v1559_v49 }
 0x710   :  { %s1858_s29 = spop %1857 }
 0x711   :  { %s1561_s21 = smax.f32 %s2091_s3, %s1858_s29 }
 0x712   :  { %v1562_v62 = vstv %s1561_s21 }
 0x713   :  { %1934 = vrcp.f32 %v1562_v62 }
 0x71d   :  { %v1935_v17 = vpop.eup %1934 }
 0x71e   :  { %1859 = vpush %v1935_v17 }
 0x74f   :  { %s1860_s9 = spop %1859 }
 0x750   :  { %v1565_v6 = vstv %s1860_s9 }
 0x751   :  { %v1566_v3 = vmul.f32 %v1565_v6, %v1541_v34  ;;  %v1567_v1 = vmul.f32 %v1565_v6, %v1542_v20  ;;  %v1568_v7 = vmul.f32 %v1565_v6, %v1543_v42  ;;  %v1569_v11 = vmul.f32 %v1565_v6, %v1544_v50 }
 0x753   :  { %1570 = vst.msk [vmem:[#allocation11] sm:$0xff] %vm983_vm14, %v1566_v3  ;;  %1571 = vst.msk [vmem:[#allocation11 + $0x8] sm:$0xff] %vm983_vm14, %v1567_v1 }
 0x754   :  { %1572 = vst.msk [vmem:[#allocation11 + $0x10] sm:$0xff] %vm983_vm14, %v1568_v7  ;;  %1573 = vst.msk [vmem:[#allocation11 + $0x18] sm:$0xff] %vm983_vm14, %v1569_v11 }
 0x755   :  { %2057 = shalt.err (!%p2054_p2)
}
 0x756   :  { %s2058_s13 = scalar_lea.hbm %s2692_s5, 512 }
 0x757   :  { %p2059_p3 = scmp.ne.s32.totalorder %s2692_s5, %s2058_s13  ;;  %p2062_p4 = scmp.lt.u32.totalorder %s2058_s13, %s2692_s5 }
 0x759   :  { %p2064_p5 = pnand %p2062_p4, %p2059_p3 }
 0x75b   :  { %2067 = shalt.err (!%p2064_p5)
}
 0x75c   :  { %1585 = dma.vmem_to_hbm [thread:$0]  %s1580_s8, 512, %s2692_s5, [#allocation4], %s2078_s30, %s2078_s30, %s2079_s6  }
 0x75d   :  { %2074 = dma.done.wait [#allocation4], 512  }
 0x75e   :  { %2075 = vsyncadd [#allocation4], 4294966784 }
 0x75f   :  { %1589 = vsyncpa [#allocation3], 1 }
 0x760   :  { %1590 = vsyncpa [#allocation6], 1 }
 0x761   :  { %1591 = vsyncpa [#allocation9], 1 }
 0x762   :  { %1592 = vsyncpa [#allocation4], 1 }

</bundles_post_ra>
